<compile_context>
chip_gen: v7x
topology: tpu7x:2x2x1
jax: 0.10.0
libtpu: 0.0.40
codegen_flags: <defaults>
</compile_context>

<pallas_src>
import functools

import jax
import jax.numpy as jnp
from jax.experimental import pallas as pl
from jax.experimental.pallas import tpu as pltpu


def _one_card_poker_kernel(param_ref, imat_ref, rmat_ref, out_ref, *, norm):
    # param_ref: (TB, 2); imat_ref / rmat_ref: (1, M*M); out_ref: (TB, M*M).
    initial = param_ref[:, 0:1]                      # (TB, 1)
    raiseval = param_ref[:, 1:2]                     # (TB, 1)
    # Fold the normalizing factor into the per-row coefficients
    # (TB elements of scalar-ish work instead of TB * M*M).
    a = initial * norm                               # scales imat
    c = (initial + raiseval) * norm                  # scales rmat
    # Single broadcasted VPU multiply-add over the lane-dense slab.
    out_ref[...] = imat_ref[...] * a + rmat_ref[...] * c


def one_card_poker_transform(param, imat, rmat, n_cards):
    """param: (B, 2) f32, imat/rmat: (4N, 4N) f32 -> (B, 4N, 4N) f32."""
    B = param.shape[0]
    M = 4 * n_cards
    MM = M * M
    norm = 1.0 / n_cards / (n_cards - 1)

    # Lane-dense flat views of the constant structure matrices.
    imat_flat = imat.reshape(1, MM).astype(jnp.float32)
    rmat_flat = rmat.reshape(1, MM).astype(jnp.float32)
    param = param.astype(jnp.float32)

    # Batch tile: whole batch if its output block stays <= ~4 MiB, otherwise a
    # multiple-of-8 row tile (Pallas masks the ragged tail block).  This keeps
    # 2x-buffered blocks well under the default scoped VMEM limits
    # (16 MiB v5e / 32 MiB v6e+v7x, 64 MiB physical on v7x).
    max_rows = max(8, ((4 * 1024 * 1024) // (MM * 4)) // 8 * 8)
    tb = B if B <= max_rows else max_rows
    grid = (pl.cdiv(B, tb),)

    kernel = functools.partial(_one_card_poker_kernel, norm=norm)
    out_flat = pl.pallas_call(
        kernel,
        out_shape=jax.ShapeDtypeStruct((B, MM), jnp.float32),
        grid=grid,
        in_specs=[
            # per-row (initial, raiseval) coefficients, tiled over the batch
            pl.BlockSpec((tb, 2), lambda b: (b, 0)),
            # constant structure matrices, same full block every grid step
            pl.BlockSpec((1, MM), lambda b: (0, 0)),
            pl.BlockSpec((1, MM), lambda b: (0, 0)),
        ],
        out_specs=pl.BlockSpec((tb, MM), lambda b: (b, 0)),
        compiler_params=pltpu.CompilerParams(
            # Batch tiles are independent -> shard across TCs on v7x megacore.
            dimension_semantics=("parallel",)),
    )(param, imat_flat, rmat_flat)

    return out_flat.reshape(B, M, M)


if __name__ == "__main__":
    n_cards = 4           # module __init__ arg; matrices are (4*nCards)^2
    M = 4 * n_cards       # 16
    batch = 2

    key = jax.random.PRNGKey(0)
    k_imat, k_rmat, k_param = jax.random.split(key, 3)

    # TODO(synk): OneCardPokerComputeP (external helper) builds the real
    # one-card-poker indicator matrices imat/rmat; replaced here by
    # deterministic synthetic constants of the same (4N, 4N) shape.
    imat = jax.random.normal(k_imat, (M, M), dtype=jnp.float32)
    rmat = jax.random.normal(k_rmat, (M, M), dtype=jnp.float32)

    # param[:, 0] = initial, param[:, 1] = raiseval
    param = jax.random.uniform(k_param, (batch, 2), dtype=jnp.float32) + 0.5

    out = one_card_poker_transform(param, imat, rmat, n_cards)
    out = jax.block_until_ready(out)

    # Pure-JAX reference for sanity.
    norm = 1.0 / n_cards / (n_cards - 1)
    initial = param[:, 0][:, None, None]
    raiseval = param[:, 1][:, None, None]
    ref = (imat[None] * initial + rmat[None] * (initial + raiseval)) * norm
    assert out.shape == (batch, M, M)
    assert jnp.allclose(out, ref, atol=1e-5, rtol=1e-5), "mismatch vs reference"

    print("KERNEL_OK")
</pallas_src>

<mosaic_0001>
module attributes {stable_mosaic.version = 11 : i64} {
  func.func @_one_card_poker_kernel(%arg0: i32, %arg1: memref<2x2xf32, #tpu.memory_space<vmem>>, %arg2: memref<1x256xf32, #tpu.memory_space<vmem>>, %arg3: memref<1x256xf32, #tpu.memory_space<vmem>>, %arg4: memref<2x256xf32, #tpu.memory_space<vmem>>) attributes {dimension_semantics = [#tpu.dimension_semantics<parallel>], iteration_bounds = array<i64: 1>, scalar_prefetch = 0 : i64, scratch_operands = 0 : i64, tpu.core_type = #tpu.core_type<tc>, window_params = [{transform_indices = @transform_0, window_bounds = array<i64: 2, 2>}, {pipeline_mode = #tpu.pipeline_mode<synchronous>, transform_indices = @transform_1, window_bounds = array<i64: 1, 256>}, {pipeline_mode = #tpu.pipeline_mode<synchronous>, transform_indices = @transform_2, window_bounds = array<i64: 1, 256>}, {transform_indices = @transform_3, window_bounds = array<i64: 2, 256>}]} {
    %c0 = arith.constant 0 : index
    %c0_0 = arith.constant 0 : index
    %0 = vector.load %arg1[%c0, %c0_0] : memref<2x2xf32, #tpu.memory_space<vmem>>, vector<2x1xf32>
    %c0_1 = arith.constant 0 : index
    %c1 = arith.constant 1 : index
    %1 = vector.load %arg1[%c0_1, %c1] : memref<2x2xf32, #tpu.memory_space<vmem>>, vector<2x1xf32>
    %cst = arith.constant 0.0833333358 : f32
    %2 = vector.broadcast %cst : f32 to vector<2x1xf32>
    %3 = arith.mulf %0, %2 : vector<2x1xf32>
    %4 = arith.addf %0, %1 : vector<2x1xf32>
    %cst_2 = arith.constant 0.0833333358 : f32
    %5 = vector.broadcast %cst_2 : f32 to vector<2x1xf32>
    %6 = arith.mulf %4, %5 : vector<2x1xf32>
    %c0_3 = arith.constant 0 : index
    %c0_4 = arith.constant 0 : index
    %7 = vector.load %arg2[%c0_3, %c0_4] : memref<1x256xf32, #tpu.memory_space<vmem>>, vector<1x256xf32>
    %8 = vector.broadcast %7 : vector<1x256xf32> to vector<2x256xf32>
    %9 = vector.broadcast %3 : vector<2x1xf32> to vector<2x256xf32>
    %10 = arith.mulf %8, %9 : vector<2x256xf32>
    %c0_5 = arith.constant 0 : index
    %c0_6 = arith.constant 0 : index
    %11 = vector.load %arg3[%c0_5, %c0_6] : memref<1x256xf32, #tpu.memory_space<vmem>>, vector<1x256xf32>
    %12 = vector.broadcast %11 : vector<1x256xf32> to vector<2x256xf32>
    %13 = vector.broadcast %6 : vector<2x1xf32> to vector<2x256xf32>
    %14 = arith.mulf %12, %13 : vector<2x256xf32>
    %15 = arith.addf %10, %14 : vector<2x256xf32>
    %c0_7 = arith.constant 0 : index
    %c0_8 = arith.constant 0 : index
    %16 = vector.load %arg4[%c0_7, %c0_8] : memref<2x256xf32, #tpu.memory_space<vmem>>, vector<2x256xf32>
    tpu.vector_store %arg4[%c0_7, %c0_8], %15 {strides = array<i32>} : memref<2x256xf32, #tpu.memory_space<vmem>>, vector<2x256xf32>,
    return
  }
  func.func @transform_0(%arg0: i32) -> (i32, i32) {
    %c0_i32 = arith.constant 0 : i32
    %c0_i32_0 = arith.constant 0 : i32
    return %arg0, %c0_i32 : i32, i32
  }
  func.func @transform_1(%arg0: i32) -> (i32, i32) {
    %c0_i32 = arith.constant 0 : i32
    %c0_i32_0 = arith.constant 0 : i32
    %c0_i32_1 = arith.constant 0 : i32
    return %c0_i32, %c0_i32_0 : i32, i32
  }
  func.func @transform_2(%arg0: i32) -> (i32, i32) {
    %c0_i32 = arith.constant 0 : i32
    %c0_i32_0 = arith.constant 0 : i32
    %c0_i32_1 = arith.constant 0 : i32
    return %c0_i32, %c0_i32_0 : i32, i32
  }
  func.func @transform_3(%arg0: i32) -> (i32, i32) {
    %c0_i32 = arith.constant 0 : i32
    %c0_i32_0 = arith.constant 0 : i32
    return %arg0, %c0_i32 : i32, i32
  }
}

</mosaic_0001>

<bundles_post_ra>
// kernel: tpu_custom_call.1
= control target key start
LH: loop header
LB: loop body
LE: loop exit
PB: predicated region body
PF: predicated region fallthrough
CT: control target
= control target key end

     0   :  { %8 = vsyncpa [#allocation3], 0  ;;  %s211_s0 = inlined_call_operand.hbm [shape: f32[2,2], index: 0, kind: input, shape index: {}]   ;;  %s212_s1 = inlined_call_operand.vmem [shape: f32[1,256], index: 1, kind: input, shape index: {}]   ;;  %s213_s2 = inlined_call_operand.vmem [shape: f32[1,256], index: 2, kind: input, shape index: {}]   ;;  %s214_s3 = inlined_call_operand.hbm [shape: f32[2,256], index: 3, kind: output, shape index: {}]  }
   0x1   :  { %9 = vsyncpa [#allocation4], 0  ;;  %s157_s12 = smov [#allocation2]   ;;  %s109_s16 = scalar_lea.hbm %s211_s0, 32 }
   0x2   :  { %s16_s13 = sshll.u32 %s157_s12, 4  ;;  %p110_p0 = scmp.ne.s32.totalorder %s211_s0, %s109_s16  ;;  %s17_s13 = int_to_ptr.vmem [resolvable:$true] %s16_s13 }
   0x3   :  { %p113_p1 = scmp.lt.u32.totalorder %s109_s16, %s211_s0 }
   0x5   :  { %p115_p2 = pnand %p113_p1, %p110_p0 }
   0x7   :  { %118 = shalt.err (!%p115_p2)
}
   0x8   :  { %s119_s21 = scalar_lea.vmem %s17_s13, 32  ;;  %p124_p4 = scmp.lt.s32.totalorder %s17_s13, %s17_s13 }
   0x9   :  { %p120_p3 = scmp.ne.s32.totalorder %s17_s13, %s119_s21  ;;  %p125_p5 = scmp.lt.s32.totalorder %s119_s21, %s119_s21 }
   0xb   :  { %p126_p6 = por %p125_p5, %p124_p4 }
   0xd   :  { %p127_p7 = pnand %p126_p6, %p120_p3 }
   0xf   :  { %130 = shalt.err (!%p127_p7)
}
  0x10   :  { %19 = dma.hbm_to_vmem [thread:$0]  %s211_s0, 32, %s17_s13, [#allocation3]  }
  0x11   :  { %153 = dma.done.wait [#allocation3], 32  }
  0x12   :  { %154 = vsyncadd [#allocation3], 4294967264  ;;  %v158_v0 = vmov 0   ;;  %v27_v1 = vld [vmem:[#allocation2] sm:$0x3]  ;;  %s159_s24 = smov 127   ;;  %v37_v6 = vlaneseq }
  0x13   :  { %108 = vset.pattern.permute.xlu1 %v158_v0  ;;  %107 = vset.pattern.permute.xlu0 %v158_v0  ;;  %v28_v2 = vmul.f32 0.083333336, %v27_v1  ;;  %v35_v10 = vld [vmem:[%s212_s1] sm:$0x3]  ;;  %s160_s28 = smov [#allocation5]  }
  0x14   :  { %30 = vrot.lane.b32.xlu0 %v27_v1, %s159_s24  ;;  %v38_v7 = vshrl.u32 %v37_v6, 7  ;;  %v54_v11 = vld [vmem:[%s213_s2] sm:$0x3]  ;;  %s93_s29 = sshll.u32 %s160_s28, 4  ;;  %s94_s29 = int_to_ptr.vmem [resolvable:$true] %s93_s29 }
  0x15   :  { %s131_s1 = scalar_lea.vmem %s94_s29, 64  ;;  %p136_p9 = scmp.lt.s32.totalorder %s94_s29, %s94_s29 }
  0x16   :  { %v39_v8 = vsub.s32 0, %v38_v7  ;;  %v43_v9 = vsub.s32 1, %v38_v7  ;;  %p132_p8 = scmp.ne.s32.totalorder %s94_s29, %s131_s1  ;;  %p137_p10 = scmp.lt.s32.totalorder %s131_s1, %s131_s1 }
  0x18   :  { %49 = vperm.xlu0 %107, %v28_v2   ;;  %v40_v12 = vrot.slane %v35_v10, %v39_v8  ;;  %v44_v13 = vrot.slane %v35_v10, %v43_v9  ;;  %v59_v15 = vrot.slane %v54_v11, %v39_v8  ;;  %v63_v16 = vrot.slane %v54_v11, %v43_v9  ;;  %p138_p11 = por %p137_p10, %p136_p9 }
  0x1a   :  { %p139_p12 = pnand %p138_p11, %p132_p8 }
  0x86   :  { %v31_v3 = vpop.permute.xlu0 %30 }
  0x87   :  { %v33_v4 = vadd.f32 %v31_v3, %v27_v1 }
  0x89   :  { %v34_v5 = vmul.f32 0.083333336, %v33_v4 }
  0x8b   :  { %68 = vperm.xlu1 %108, %v34_v5  }
  0x97   :  { %v50_v14 = vpop.permute.xlu0 %49 }
  0x98   :  { %v52_v17 = vmul.f32 %v50_v14, %v40_v12  ;;  %v53_v18 = vmul.f32 %v50_v14, %v44_v13 }
 0x10a   :  { %v69_v19 = vpop.permute.xlu1 %68 }
 0x10b   :  { %v71_v20 = vmul.f32 %v69_v19, %v59_v15  ;;  %v72_v21 = vmul.f32 %v69_v19, %v63_v16 }
 0x10d   :  { %v73_v22 = vadd.f32 %v71_v20, %v52_v17  ;;  %v74_v23 = vadd.f32 %v72_v21, %v53_v18 }
 0x10f   :  { %v77_v24 = vcombine.low %v73_v22, %v74_v23 }
 0x111   :  { %102 = vst.sshfl [vmem:[#allocation5] sm:$0x33 pattern:$0x76325410] %v77_v24 }
 0x112   :  { %142 = shalt.err (!%p139_p12)
}
 0x113   :  { %s143_s4 = scalar_lea.hbm %s214_s3, 64 }
 0x114   :  { %p144_p13 = scmp.ne.s32.totalorder %s214_s3, %s143_s4  ;;  %p147_p0 = scmp.lt.u32.totalorder %s143_s4, %s214_s3 }
 0x116   :  { %p149_p1 = pnand %p147_p0, %p144_p13 }
 0x118   :  { %152 = shalt.err (!%p149_p1)
}
 0x119   :  { %96 = dma.vmem_to_hbm [thread:$0]  %s94_s29, 64, %s214_s3, [#allocation4]  }
 0x11a   :  { %155 = dma.done.wait [#allocation4], 64  }
 0x11b   :  { %156 = vsyncadd [#allocation4], 4294967232 }
 0x11c   :  { %100 = vsyncpa [#allocation3], 1 }
 0x11d   :  { %101 = vsyncpa [#allocation4], 1 }

</bundles_post_ra>
